<compile_context>
chip_gen: v6e
topology: v6e:2x2x1
jax: 0.10.0
libtpu: 0.0.40
codegen_flags: <defaults>
</compile_context>

<pallas_src>
import jax
import jax.numpy as jnp
from jax.experimental import pallas as pl
from jax.experimental.pallas import tpu as pltpu


# Model dims (PyTorch autoencoder: 113 -> 100 -> 50 -> 10 -> 50 -> 100 -> 113)
D_IN = 113
D_H1 = 100
D_H2 = 50
D_LAT = 10


# ---------------------------------------------------------------------------
# Kernel: full forward pass for one batch tile (6 matmuls + ReLU/Sigmoid)
# ---------------------------------------------------------------------------
def autoencoder_kernel(
    x_ref,
    w1_ref, b1_ref, w2_ref, b2_ref, w3_ref, b3_ref,
    w4_ref, b4_ref, w5_ref, b5_ref, w6_ref, b6_ref,
    enc_ref, dec_ref,
):
    x = x_ref[...].astype(jnp.bfloat16)                              # (TB, 113)

    # ---- encoder -----------------------------------------------------------
    h = jnp.dot(x, w1_ref[...], preferred_element_type=jnp.float32) + b1_ref[...]
    h = jnp.maximum(h, 0.0)                                          # ReLU
    h = jnp.dot(h.astype(jnp.bfloat16), w2_ref[...],
                preferred_element_type=jnp.float32) + b2_ref[...]
    h = jnp.maximum(h, 0.0)                                          # ReLU
    enc = jnp.dot(h.astype(jnp.bfloat16), w3_ref[...],
                  preferred_element_type=jnp.float32) + b3_ref[...]  # (TB, 10)
    enc_ref[...] = enc.astype(enc_ref.dtype)                         # bf16 store

    # ---- decoder -----------------------------------------------------------
    d = jnp.dot(enc.astype(jnp.bfloat16), w4_ref[...],
                preferred_element_type=jnp.float32) + b4_ref[...]
    d = jnp.maximum(d, 0.0)                                          # ReLU
    d = jnp.dot(d.astype(jnp.bfloat16), w5_ref[...],
                preferred_element_type=jnp.float32) + b5_ref[...]
    d = jnp.maximum(d, 0.0)                                          # ReLU
    d = jnp.dot(d.astype(jnp.bfloat16), w6_ref[...],
                preferred_element_type=jnp.float32) + b6_ref[...]    # (TB, 113)
    # Sigmoid via exp + EUP reciprocal (free VLIW slot, kernel is HBM-bound).
    # Clamp the exponent so exp never overflows into the approx reciprocal.
    neg = jnp.minimum(-d, 30.0)
    dec = pl.reciprocal(1.0 + jnp.exp(neg), approx=True)
    dec_ref[...] = dec.astype(dec_ref.dtype)                         # bf16 store


# ---------------------------------------------------------------------------
# Parameter preparation: bf16 weights, f32 biases, natural (unpadded) shapes
# ---------------------------------------------------------------------------
def prepare_kernel_params(params):
    out = []
    for i in range(1, 7):
        out.append(params[f"w{i}"].astype(jnp.bfloat16))   # (in, out)
        out.append(params[f"b{i}"])                        # (1, out) f32
    return out


def _round_up(x, m):
    return ((x + m - 1) // m) * m


def _cdiv(a, b):
    return (a + b - 1) // b


# ---------------------------------------------------------------------------
# Wrapper
# ---------------------------------------------------------------------------
def autoencoder_forward(x, params, *, tile_b=2048):
    """x: (B, 113) float32. Returns (enc (B,10) bf16, dec (B,113) bf16).

    Outputs are bf16 (HBM-bound kernel); cast to f32 downstream only if needed.
    """
    B = x.shape[0]
    kparams = prepare_kernel_params(params)

    # Batch tiling:
    #  * multiple of 8 sublanes,
    #  * capped at ceil(B/2) so the grid has >=2 steps when possible
    #    (both v7x TensorCores participate; also avoids dead-row padding),
    #  * no batch padding: the last partial block is clipped by Pallas.
    tile_b = max(8, min(tile_b, _round_up(_cdiv(B, 2), 8)))
    grid = (_cdiv(B, tile_b),)

    # Weights / biases: full-extent blocks, constant index_map -> copied into
    # VMEM once and kept resident across all batch tiles (~70 KB total).
    in_specs = [pl.BlockSpec((tile_b, D_IN), lambda i: (i, 0))]
    in_specs += [pl.BlockSpec(a.shape, lambda i: (0, 0)) for a in kparams]

    out_specs = (
        pl.BlockSpec((tile_b, D_LAT), lambda i: (i, 0)),
        pl.BlockSpec((tile_b, D_IN), lambda i: (i, 0)),
    )
    out_shape = (
        jax.ShapeDtypeStruct((B, D_LAT), jnp.bfloat16),
        jax.ShapeDtypeStruct((B, D_IN), jnp.bfloat16),
    )

    flops = 2 * B * (D_IN * D_H1 + D_H1 * D_H2 + D_H2 * D_LAT
                     + D_LAT * D_H2 + D_H2 * D_H1 + D_H1 * D_IN)
    weight_bytes = sum(int(a.size) * a.dtype.itemsize for a in kparams)
    bytes_accessed = (B * D_IN * 4                 # x read (f32)
                      + B * (D_LAT + D_IN) * 2     # enc + dec writes (bf16)
                      + weight_bytes)

    enc, dec = pl.pallas_call(
        autoencoder_kernel,
        out_shape=out_shape,
        grid=grid,
        in_specs=in_specs,
        out_specs=out_specs,
        compiler_params=pltpu.CompilerParams(
            dimension_semantics=("parallel",),
            vmem_limit_bytes=32 * 1024 * 1024),
        cost_estimate=pl.CostEstimate(
            flops=flops,
            transcendentals=2 * B * D_IN,
            bytes_accessed=bytes_accessed),
    )(x, *kparams)

    return enc, dec


# ---------------------------------------------------------------------------
# Deterministic parameter init (mimics nn.Linear shapes; synthetic values)
# ---------------------------------------------------------------------------
def init_params(key):
    dims = [(D_IN, D_H1), (D_H1, D_H2), (D_H2, D_LAT),
            (D_LAT, D_H2), (D_H2, D_H1), (D_H1, D_IN)]
    params = {}
    for i, (fan_in, fan_out) in enumerate(dims, start=1):
        key, kw, kb = jax.random.split(key, 3)
        bound = 1.0 / jnp.sqrt(fan_in)
        # PyTorch stores weight as (out, in); we store (in, out) for x @ W.
        w_pt = jax.random.uniform(kw, (fan_out, fan_in), jnp.float32, -bound, bound)
        b = jax.random.uniform(kb, (fan_out,), jnp.float32, -bound, bound)
        params[f"w{i}"] = jnp.transpose(w_pt)            # (in, out)
        params[f"b{i}"] = b.reshape(1, fan_out)          # (1, out) for broadcast
    return params


def reference_forward(x, params):
    """Pure-JAX f32 reference matching the PyTorch module."""
    h = jnp.maximum(x @ params["w1"] + params["b1"], 0.0)
    h = jnp.maximum(h @ params["w2"] + params["b2"], 0.0)
    enc = h @ params["w3"] + params["b3"]
    d = jnp.maximum(enc @ params["w4"] + params["b4"], 0.0)
    d = jnp.maximum(d @ params["w5"] + params["b5"], 0.0)
    dec = jax.nn.sigmoid(d @ params["w6"] + params["b6"])
    return enc, dec


if __name__ == "__main__":
    key = jax.random.PRNGKey(0)
    key, kx = jax.random.split(key)

    B = 16
    x = jax.random.uniform(kx, (B, D_IN), jnp.float32)   # input in [0,1)
    params = init_params(key)

    enc, dec = autoencoder_forward(x, params)
    jax.block_until_ready((enc, dec))

    enc_ref, dec_ref = reference_forward(x, params)
    assert enc.shape == (B, D_LAT) and dec.shape == (B, D_IN)
    enc_f32 = enc.astype(jnp.float32)
    dec_f32 = dec.astype(jnp.float32)
    # bf16 MXU inputs, bf16 output storage, approx EUP reciprocal => slightly
    # looser tolerance than the pure-f32 reference (expected quantization).
    assert jnp.allclose(enc_f32, enc_ref, atol=2e-2, rtol=2e-2), \
        float(jnp.max(jnp.abs(enc_f32 - enc_ref)))
    assert jnp.allclose(dec_f32, dec_ref, atol=2e-2, rtol=2e-2), \
        float(jnp.max(jnp.abs(dec_f32 - dec_ref)))

    print("KERNEL_OK")
</pallas_src>

<mosaic_0001>
module attributes {stable_mosaic.version = 11 : i64} {
  func.func @autoencoder_kernel(%arg0: i32, %arg1: memref<8x113xf32, #tpu.memory_space<vmem>>, %arg2: memref<113x100xbf16, #tpu.memory_space<vmem>>, %arg3: memref<1x100xf32, #tpu.memory_space<vmem>>, %arg4: memref<100x50xbf16, #tpu.memory_space<vmem>>, %arg5: memref<1x50xf32, #tpu.memory_space<vmem>>, %arg6: memref<50x10xbf16, #tpu.memory_space<vmem>>, %arg7: memref<1x10xf32, #tpu.memory_space<vmem>>, %arg8: memref<10x50xbf16, #tpu.memory_space<vmem>>, %arg9: memref<1x50xf32, #tpu.memory_space<vmem>>, %arg10: memref<50x100xbf16, #tpu.memory_space<vmem>>, %arg11: memref<1x100xf32, #tpu.memory_space<vmem>>, %arg12: memref<100x113xbf16, #tpu.memory_space<vmem>>, %arg13: memref<1x113xf32, #tpu.memory_space<vmem>>, %arg14: memref<8x10xbf16, #tpu.memory_space<vmem>>, %arg15: memref<8x113xbf16, #tpu.memory_space<vmem>>) attributes {dimension_semantics = [#tpu.dimension_semantics<parallel>], iteration_bounds = array<i64: 2>, scalar_prefetch = 0 : i64, scratch_operands = 0 : i64, tpu.core_type = #tpu.core_type<tc>, window_params = [{transform_indices = @transform_0, window_bounds = array<i64: 8, 113>}, {pipeline_mode = #tpu.pipeline_mode<synchronous>, transform_indices = @transform_1, window_bounds = array<i64: 113, 100>}, {pipeline_mode = #tpu.pipeline_mode<synchronous>, transform_indices = @transform_2, window_bounds = array<i64: 1, 100>}, {pipeline_mode = #tpu.pipeline_mode<synchronous>, transform_indices = @transform_3, window_bounds = array<i64: 100, 50>}, {pipeline_mode = #tpu.pipeline_mode<synchronous>, transform_indices = @transform_4, window_bounds = array<i64: 1, 50>}, {pipeline_mode = #tpu.pipeline_mode<synchronous>, transform_indices = @transform_5, window_bounds = array<i64: 50, 10>}, {pipeline_mode = #tpu.pipeline_mode<synchronous>, transform_indices = @transform_6, window_bounds = array<i64: 1, 10>}, {pipeline_mode = #tpu.pipeline_mode<synchronous>, transform_indices = @transform_7, window_bounds = array<i64: 10, 50>}, {pipeline_mode = #tpu.pipeline_mode<synchronous>, transform_indices = @transform_8, window_bounds = array<i64: 1, 50>}, {pipeline_mode = #tpu.pipeline_mode<synchronous>, transform_indices = @transform_9, window_bounds = array<i64: 50, 100>}, {pipeline_mode = #tpu.pipeline_mode<synchronous>, transform_indices = @transform_10, window_bounds = array<i64: 1, 100>}, {pipeline_mode = #tpu.pipeline_mode<synchronous>, transform_indices = @transform_11, window_bounds = array<i64: 100, 113>}, {pipeline_mode = #tpu.pipeline_mode<synchronous>, transform_indices = @transform_12, window_bounds = array<i64: 1, 113>}, {transform_indices = @transform_13, window_bounds = array<i64: 8, 10>}, {transform_indices = @transform_14, window_bounds = array<i64: 8, 113>}]} {
    %c0 = arith.constant 0 : index
    %c0_0 = arith.constant 0 : index
    %0 = vector.load %arg1[%c0, %c0_0] : memref<8x113xf32, #tpu.memory_space<vmem>>, vector<8x113xf32>
    %1 = arith.truncf %0 : vector<8x113xf32> to vector<8x113xbf16>
    %c0_1 = arith.constant 0 : index
    %c0_2 = arith.constant 0 : index
    %2 = vector.load %arg2[%c0_1, %c0_2] : memref<113x100xbf16, #tpu.memory_space<vmem>>, vector<113x100xbf16>
    %cst = arith.constant dense<0.000000e+00> : vector<8x100xf32>
    %3 = tpu.matmul %1, %2, %cst {dimension_numbers = #tpu.dot_dimension_numbers<[1], [0], [0], [1], [0, 0, 1, 1], [], []>} : vector<8x113xbf16>, vector<113x100xbf16>, vector<8x100xf32> -> vector<8x100xf32>
    %c0_3 = arith.constant 0 : index
    %c0_4 = arith.constant 0 : index
    %4 = vector.load %arg3[%c0_3, %c0_4] : memref<1x100xf32, #tpu.memory_space<vmem>>, vector<1x100xf32>
    %5 = vector.broadcast %4 : vector<1x100xf32> to vector<8x100xf32>
    %6 = arith.addf %3, %5 : vector<8x100xf32>
    %cst_5 = arith.constant 0.000000e+00 : f32
    %7 = vector.broadcast %cst_5 : f32 to vector<8x100xf32>
    %8 = arith.maximumf %6, %7 : vector<8x100xf32>
    %9 = arith.truncf %8 : vector<8x100xf32> to vector<8x100xbf16>
    %c0_6 = arith.constant 0 : index
    %c0_7 = arith.constant 0 : index
    %10 = vector.load %arg4[%c0_6, %c0_7] : memref<100x50xbf16, #tpu.memory_space<vmem>>, vector<100x50xbf16>
    %cst_8 = arith.constant dense<0.000000e+00> : vector<8x50xf32>
    %11 = tpu.matmul %9, %10, %cst_8 {dimension_numbers = #tpu.dot_dimension_numbers<[1], [0], [0], [1], [0, 0, 1, 1], [], []>} : vector<8x100xbf16>, vector<100x50xbf16>, vector<8x50xf32> -> vector<8x50xf32>
    %c0_9 = arith.constant 0 : index
    %c0_10 = arith.constant 0 : index
    %12 = vector.load %arg5[%c0_9, %c0_10] : memref<1x50xf32, #tpu.memory_space<vmem>>, vector<1x50xf32>
    %13 = vector.broadcast %12 : vector<1x50xf32> to vector<8x50xf32>
    %14 = arith.addf %11, %13 : vector<8x50xf32>
    %cst_11 = arith.constant 0.000000e+00 : f32
    %15 = vector.broadcast %cst_11 : f32 to vector<8x50xf32>
    %16 = arith.maximumf %14, %15 : vector<8x50xf32>
    %17 = arith.truncf %16 : vector<8x50xf32> to vector<8x50xbf16>
    %c0_12 = arith.constant 0 : index
    %c0_13 = arith.constant 0 : index
    %18 = vector.load %arg6[%c0_12, %c0_13] : memref<50x10xbf16, #tpu.memory_space<vmem>>, vector<50x10xbf16>
    %cst_14 = arith.constant dense<0.000000e+00> : vector<8x10xf32>
    %19 = tpu.matmul %17, %18, %cst_14 {dimension_numbers = #tpu.dot_dimension_numbers<[1], [0], [0], [1], [0, 0, 1, 1], [], []>} : vector<8x50xbf16>, vector<50x10xbf16>, vector<8x10xf32> -> vector<8x10xf32>
    %c0_15 = arith.constant 0 : index
    %c0_16 = arith.constant 0 : index
    %20 = vector.load %arg7[%c0_15, %c0_16] : memref<1x10xf32, #tpu.memory_space<vmem>>, vector<1x10xf32>
    %21 = vector.broadcast %20 : vector<1x10xf32> to vector<8x10xf32>
    %22 = arith.addf %19, %21 : vector<8x10xf32>
    %23 = arith.truncf %22 : vector<8x10xf32> to vector<8x10xbf16>
    %c0_17 = arith.constant 0 : index
    %c0_18 = arith.constant 0 : index
    %24 = vector.load %arg14[%c0_17, %c0_18] : memref<8x10xbf16, #tpu.memory_space<vmem>>, vector<8x10xbf16>
    tpu.vector_store %arg14[%c0_17, %c0_18], %23 {strides = array<i32>} : memref<8x10xbf16, #tpu.memory_space<vmem>>, vector<8x10xbf16>,
    %25 = arith.truncf %22 : vector<8x10xf32> to vector<8x10xbf16>
    %c0_19 = arith.constant 0 : index
    %c0_20 = arith.constant 0 : index
    %26 = vector.load %arg8[%c0_19, %c0_20] : memref<10x50xbf16, #tpu.memory_space<vmem>>, vector<10x50xbf16>
    %cst_21 = arith.constant dense<0.000000e+00> : vector<8x50xf32>
    %27 = tpu.matmul %25, %26, %cst_21 {dimension_numbers = #tpu.dot_dimension_numbers<[1], [0], [0], [1], [0, 0, 1, 1], [], []>} : vector<8x10xbf16>, vector<10x50xbf16>, vector<8x50xf32> -> vector<8x50xf32>
    %c0_22 = arith.constant 0 : index
    %c0_23 = arith.constant 0 : index
    %28 = vector.load %arg9[%c0_22, %c0_23] : memref<1x50xf32, #tpu.memory_space<vmem>>, vector<1x50xf32>
    %29 = vector.broadcast %28 : vector<1x50xf32> to vector<8x50xf32>
    %30 = arith.addf %27, %29 : vector<8x50xf32>
    %cst_24 = arith.constant 0.000000e+00 : f32
    %31 = vector.broadcast %cst_24 : f32 to vector<8x50xf32>
    %32 = arith.maximumf %30, %31 : vector<8x50xf32>
    %33 = arith.truncf %32 : vector<8x50xf32> to vector<8x50xbf16>
    %c0_25 = arith.constant 0 : index
    %c0_26 = arith.constant 0 : index
    %34 = vector.load %arg10[%c0_25, %c0_26] : memref<50x100xbf16, #tpu.memory_space<vmem>>, vector<50x100xbf16>
    %cst_27 = arith.constant dense<0.000000e+00> : vector<8x100xf32>
    %35 = tpu.matmul %33, %34, %cst_27 {dimension_numbers = #tpu.dot_dimension_numbers<[1], [0], [0], [1], [0, 0, 1, 1], [], []>} : vector<8x50xbf16>, vector<50x100xbf16>, vector<8x100xf32> -> vector<8x100xf32>
    %c0_28 = arith.constant 0 : index
    %c0_29 = arith.constant 0 : index
    %36 = vector.load %arg11[%c0_28, %c0_29] : memref<1x100xf32, #tpu.memory_space<vmem>>, vector<1x100xf32>
    %37 = vector.broadcast %36 : vector<1x100xf32> to vector<8x100xf32>
    %38 = arith.addf %35, %37 : vector<8x100xf32>
    %cst_30 = arith.constant 0.000000e+00 : f32
    %39 = vector.broadcast %cst_30 : f32 to vector<8x100xf32>
    %40 = arith.maximumf %38, %39 : vector<8x100xf32>
    %41 = arith.truncf %40 : vector<8x100xf32> to vector<8x100xbf16>
    %c0_31 = arith.constant 0 : index
    %c0_32 = arith.constant 0 : index
    %42 = vector.load %arg12[%c0_31, %c0_32] : memref<100x113xbf16, #tpu.memory_space<vmem>>, vector<100x113xbf16>
    %cst_33 = arith.constant dense<0.000000e+00> : vector<8x113xf32>
    %43 = tpu.matmul %41, %42, %cst_33 {dimension_numbers = #tpu.dot_dimension_numbers<[1], [0], [0], [1], [0, 0, 1, 1], [], []>} : vector<8x100xbf16>, vector<100x113xbf16>, vector<8x113xf32> -> vector<8x113xf32>
    %c0_34 = arith.constant 0 : index
    %c0_35 = arith.constant 0 : index
    %44 = vector.load %arg13[%c0_34, %c0_35] : memref<1x113xf32, #tpu.memory_space<vmem>>, vector<1x113xf32>
    %45 = vector.broadcast %44 : vector<1x113xf32> to vector<8x113xf32>
    %46 = arith.addf %43, %45 : vector<8x113xf32>
    %cst_36 = arith.constant 0.000000e+00 : f32
    %47 = vector.broadcast %cst_36 : f32 to vector<8x113xf32>
    %48 = arith.subf %47, %46 : vector<8x113xf32>
    %cst_37 = arith.constant 3.000000e+01 : f32
    %49 = vector.broadcast %cst_37 : f32 to vector<8x113xf32>
    %50 = arith.minimumf %48, %49 : vector<8x113xf32>
    %51 = math.exp %50 : vector<8x113xf32>
    %cst_38 = arith.constant 1.000000e+00 : f32
    %52 = vector.broadcast %cst_38 : f32 to vector<8x113xf32>
    %53 = arith.addf %52, %51 : vector<8x113xf32>
    %54 = tpu.reciprocal %53 {approx = true} : vector<8x113xf32> -> vector<8x113xf32>
    %55 = arith.truncf %54 : vector<8x113xf32> to vector<8x113xbf16>
    %c0_39 = arith.constant 0 : index
    %c0_40 = arith.constant 0 : index
    %56 = vector.load %arg15[%c0_39, %c0_40] : memref<8x113xbf16, #tpu.memory_space<vmem>>, vector<8x113xbf16>
    tpu.vector_store %arg15[%c0_39, %c0_40], %55 {strides = array<i32>} : memref<8x113xbf16, #tpu.memory_space<vmem>>, vector<8x113xbf16>,
    return
  }
  func.func @transform_0(%arg0: i32) -> (i32, i32) {
    %c0_i32 = arith.constant 0 : i32
    %c0_i32_0 = arith.constant 0 : i32
    return %arg0, %c0_i32 : i32, i32
  }
  func.func @transform_1(%arg0: i32) -> (i32, i32) {
    %c0_i32 = arith.constant 0 : i32
    %c0_i32_0 = arith.constant 0 : i32
    %c0_i32_1 = arith.constant 0 : i32
    return %c0_i32, %c0_i32_0 : i32, i32
  }
  func.func @transform_2(%arg0: i32) -> (i32, i32) {
    %c0_i32 = arith.constant 0 : i32
    %c0_i32_0 = arith.constant 0 : i32
    %c0_i32_1 = arith.constant 0 : i32
    return %c0_i32, %c0_i32_0 : i32, i32
  }
  func.func @transform_3(%arg0: i32) -> (i32, i32) {
    %c0_i32 = arith.constant 0 : i32
    %c0_i32_0 = arith.constant 0 : i32
    %c0_i32_1 = arith.constant 0 : i32
    return %c0_i32, %c0_i32_0 : i32, i32
  }
  func.func @transform_4(%arg0: i32) -> (i32, i32) {
    %c0_i32 = arith.constant 0 : i32
    %c0_i32_0 = arith.constant 0 : i32
    %c0_i32_1 = arith.constant 0 : i32
    return %c0_i32, %c0_i32_0 : i32, i32
  }
  func.func @transform_5(%arg0: i32) -> (i32, i32) {
    %c0_i32 = arith.constant 0 : i32
    %c0_i32_0 = arith.constant 0 : i32
    %c0_i32_1 = arith.constant 0 : i32
    return %c0_i32, %c0_i32_0 : i32, i32
  }
  func.func @transform_6(%arg0: i32) -> (i32, i32) {
    %c0_i32 = arith.constant 0 : i32
    %c0_i32_0 = arith.constant 0 : i32
    %c0_i32_1 = arith.constant 0 : i32
    return %c0_i32, %c0_i32_0 : i32, i32
  }
  func.func @transform_7(%arg0: i32) -> (i32, i32) {
    %c0_i32 = arith.constant 0 : i32
    %c0_i32_0 = arith.constant 0 : i32
    %c0_i32_1 = arith.constant 0 : i32
    return %c0_i32, %c0_i32_0 : i32, i32
  }
  func.func @transform_8(%arg0: i32) -> (i32, i32) {
    %c0_i32 = arith.constant 0 : i32
    %c0_i32_0 = arith.constant 0 : i32
    %c0_i32_1 = arith.constant 0 : i32
    return %c0_i32, %c0_i32_0 : i32, i32
  }
  func.func @transform_9(%arg0: i32) -> (i32, i32) {
    %c0_i32 = arith.constant 0 : i32
    %c0_i32_0 = arith.constant 0 : i32
    %c0_i32_1 = arith.constant 0 : i32
    return %c0_i32, %c0_i32_0 : i32, i32
  }
  func.func @transform_10(%arg0: i32) -> (i32, i32) {
    %c0_i32 = arith.constant 0 : i32
    %c0_i32_0 = arith.constant 0 : i32
    %c0_i32_1 = arith.constant 0 : i32
    return %c0_i32, %c0_i32_0 : i32, i32
  }
  func.func @transform_11(%arg0: i32) -> (i32, i32) {
    %c0_i32 = arith.constant 0 : i32
    %c0_i32_0 = arith.constant 0 : i32
    %c0_i32_1 = arith.constant 0 : i32
    return %c0_i32, %c0_i32_0 : i32, i32
  }
  func.func @transform_12(%arg0: i32) -> (i32, i32) {
    %c0_i32 = arith.constant 0 : i32
    %c0_i32_0 = arith.constant 0 : i32
    %c0_i32_1 = arith.constant 0 : i32
    return %c0_i32, %c0_i32_0 : i32, i32
  }
  func.func @transform_13(%arg0: i32) -> (i32, i32) {
    %c0_i32 = arith.constant 0 : i32
    %c0_i32_0 = arith.constant 0 : i32
    return %arg0, %c0_i32 : i32, i32
  }
  func.func @transform_14(%arg0: i32) -> (i32, i32) {
    %c0_i32 = arith.constant 0 : i32
    %c0_i32_0 = arith.constant 0 : i32
    return %arg0, %c0_i32 : i32, i32
  }
}

</mosaic_0001>

<bundles_post_ra>
// kernel: tpu_custom_call.1
= control target key start
LH: loop header
LB: loop body
LE: loop exit
PB: predicated region body
PF: predicated region fallthrough
CT: control target
= control target key end

     0   :  { %s1889_s0 = inlined_call_operand.vmem [shape: f32[16,113], index: 0, kind: input, shape index: {}]   ;;  %s1890_s1 = inlined_call_operand.vmem [shape: bf16[113,100], index: 1, kind: input, shape index: {}]   ;;  %s1891_s2 = inlined_call_operand.vmem [shape: f32[1,100], index: 2, kind: input, shape index: {}]   ;;  %s1892_s3 = inlined_call_operand.vmem [shape: bf16[100,50], index: 3, kind: input, shape index: {}]   ;;  %s1893_s4 = inlined_call_operand.vmem [shape: f32[1,50], index: 4, kind: input, shape index: {}]   ;;  %s1894_s5 = inlined_call_operand.vmem [shape: bf16[50,10], index: 5, kind: input, shape index: {}]   ;;  %s1895_s6 = inlined_call_operand.vmem [shape: f32[1,10], index: 6, kind: input, shape index: {}]   ;;  %s1896_s7 = inlined_call_operand.vmem [shape: bf16[10,50], index: 7, kind: input, shape index: {}]   ;;  %s1897_s8 = inlined_call_operand.vmem [shape: f32[1,50], index: 8, kind: input, shape index: {}]   ;;  %s1898_s9 = inlined_call_operand.vmem [shape: bf16[50,100], index: 9, kind: input, shape index: {}]   ;;  %s1899_s10 = inlined_call_operand.vmem [shape: f32[1,100], index: 10, kind: input, shape index: {}]   ;;  %s1900_s11 = inlined_call_operand.vmem [shape: bf16[100,113], index: 11, kind: input, shape index: {}]   ;;  %s1901_s12 = inlined_call_operand.vmem [shape: f32[1,113], index: 12, kind: input, shape index: {}]   ;;  %s1902_s13 = inlined_call_operand.hbm [shape: bf16[16,10], index: 13, kind: output, shape index: {0}]   ;;  %s1903_s14 = inlined_call_operand.hbm [shape: bf16[16,113], index: 14, kind: output, shape index: {1}]  }
   0x1   :  { %1909 = sst [smem:[#allocation11_spill]] %s1889_s0 }
   0x2   :  { %1910 = sst [smem:[#allocation12_spill]] %s1890_s1 }
   0x3   :  { %1911 = sst [smem:[#allocation13_spill]] %s1891_s2 }
   0x4   :  { %1912 = sst [smem:[#allocation14_spill]] %s1892_s3 }
   0x5   :  { %20 = vsyncpa [#allocation3], 0 }
   0x6   :  { %22 = vsyncpa [#allocation3 + $0x1], 0 }
   0x7   :  { %23 = vsyncpa [#allocation5], 0 }
   0x8   :  { %25 = vsyncpa [#allocation5 + $0x1], 0  ;;  %s1607_s29 = smov 0   ;;  %s1609_s30 = smov 0  }
   0x9   :  { %s1611_s15 = smov 0   ;;  %s1613_s16 = smov 0  }
   0xa LB: > { %1913 = sst [smem:[#allocation8_spill]] %s1521_s15  ;;  %s1628_s17 = sadd.s32 4294967295, %s1525_s16   ;;  %s1525_s16 = sphi %s1613_s16, %s1924_s16   ;;  %s1521_s15 = sphi %s1611_s15, %s1926_s15   ;;  %s1517_s30 = sphi %s1609_s30, %s1928_s30   ;;  %s1513_s29 = sphi %s1607_s29, %s1927_s29  }
   0xb   : > { %s1174_s18 = sadd.s32 4294967294, %s1525_s16   ;;  %s1632_s19 = sadd.s32 1, %s1525_s16  }
   0xc   : > { %1914 = sst [smem:[#allocation9_spill]] %s1632_s19  ;;  %s316_s20 = sadd.s32 1, %s1521_s15 }
   0xd   : > { %s313_s21 = ssub.s32 %s1525_s16, %s1632_s19  ;;  %p326_p0 = scmp.ne.s32.totalorder %s1521_s15, %s1517_s30 }
   0xe   : > { %p314_p1 = scmp.eq.s32.totalorder %s313_s21, 0  ;;  %p327_p2 = scmp.eq.s32.totalorder %s1628_s17, 1 }
   0xf   : > { %p332_p3 = scmp.ne.s32.totalorder %s1517_s30, %s1513_s29  ;;  %p333_p4 = scmp.eq.s32.totalorder %s1174_s18, 1 }
  0x10   : > { %s1643_s22 = scalar_select %p314_p1, %s1521_s15, %s316_s20  }
  0x11   : > { %p1645_p5 = por %p327_p2, %p326_p0  ;;  %p1649_p6 = por %p333_p4, %p332_p3 }
  0x12   : > { %1915 = sst [smem:[#allocation10_spill]] %s1643_s22  ;;  %p1177_p7 = scmp.ge.s32.totalorder %s1525_s16, 1 }
  0x13   : > { %p420_p8 = scmp.lt.s32.totalorder %s1525_s16, 3 }
  0x15   : > { %p421_p9 = pnand %p1177_p7, %p420_p8 }
  0x16   : > { %s1918_s1 = sld [smem:[#allocation12_spill]] (!%p421_p9)  ;;  %p470_p10 = scmp.lt.s32.totalorder (!%p421_p9), %s1628_s17, 1 }
  0x17   : > { %424 = sbr.rel (%p421_p9) target bundleno = 1302 (0x516), region = 72  ;;  %s1919_s3 = sld [smem:[#allocation14_spill]] (!%p421_p9) }
  0x18   : > { %s1920_s0 = sld [smem:[#allocation11_spill]] (!%p421_p9)  ;;  %s1530_s20 = smov (!%p421_p9), [#allocation2]  }
  0x19   : > { %s1921_s2 = sld [smem:[#allocation13_spill]] (!%p421_p9) }
  0x1c   : > { %v1400_v0 = vld [vmem:[%s1918_s1 + $0x38] ss:$0 sps:$4 sm:$0x11]   ;;  %v1527_v1 = vmov 0.0   ;;  %vm548_vm0 = vcmask 1040384   ;;  %v1528_v2 = vmov 0  }
  0x1d   : > { %1267 = vmatprep.subr.bf16.mxu0 %v1527_v1  ;;  %1287 = vmatprep.subr.bf16.mxu1 %v1527_v1  ;;  %v550_v3 = vsel %vm548_vm0, 65535, %v1528_v2  ;;  %vm1529_vm1 = vmmov 0   ;;  %v1401_v5 = vld [vmem:[%s1918_s1 + $0x30] sm:$0xff]   ;;  %vm659_vm2 = vcmask 1041408   ;;  %v1402_v6 = vld [vmem:[%s1918_s1 + $0x28] sm:$0xff]   ;;  %s471_s26 = scalar_select %p470_p10, %s1628_s17, 1 }
  0x1e   : > { %v552_v4 = vand.u32 %v1400_v0, %v550_v3  ;;  %1283 = vmatprep.mubr.msk.bf16.mxu0 %vm1529_vm1, %v1527_v1  ;;  %1301 = vmatprep.mubr.msk.bf16.mxu1 %vm1529_vm1, %v1527_v1  ;;  %v1408_v7 = vld [vmem:[%s1919_s3 + $0x30] ss:$0 sps:$4 sm:$0x33]   ;;  %v1410_v9 = vld [vmem:[%s1919_s3 + $0x28] sm:$0xff]   ;;  %v1403_v10 = vld [vmem:[%s1918_s1 + $0x20] sm:$0xff]   ;;  %vm544_vm3 = vcmask 924672  }
  0x1f   : > { %v661_v8 = vsel %vm659_vm2, %v1408_v7, 0  ;;  %s1180_s18 = sshll.u32 %s471_s26, 3  ;;  %v1411_v11 = vld [vmem:[%s1919_s3 + $0x20] sm:$0xff]   ;;  %v1404_v12 = vld [vmem:[%s1918_s1 + $0x18] sm:$0xff]   ;;  %v1405_v14 = vld [vmem:[%s1918_s1 + $0x10] sm:$0xff]   ;;  %vm655_vm4 = vcmask 818176  }
  0x20   : > { %1268 = vmatpush3.bf16.msra.mxu0 %v552_v4  ;;  %1288 = vmatpush3.bf16.msra.mxu1 %v661_v8  ;;  %v1412_v13 = vld [vmem:[%s1919_s3 + $0x18] sm:$0xff]   ;;  %v1413_v15 = vld [vmem:[%s1919_s3 + $0x10] sm:$0xff]   ;;  %v1406_v16 = vld [vmem:[%s1918_s1 + $0x8] sm:$0xff]   ;;  %s473_s22 = scalar_lea.vmem %s1920_s0, %s1180_s18  ;;  %vm808_vm5 = vcmask 1044480   ;;  %vm740_vm6 = vcmask 408576   ;;  %s1769_s18 = sand.u32 1, %s1517_s30  }
  0x21   : > { %1269 = vmatprep.subr.bf16.mxu0 %v1527_v1  ;;  %1289 = vmatprep.subr.bf16.mxu1 %v1527_v1  ;;  %v1407_v17 = vld [vmem:[%s1918_s1] sm:$0xff]   ;;  %v1414_v20 = vld [vmem:[%s1919_s3 + $0x8] sm:$0xff]   ;;  %v1416_v25 = vld [vmem:[%s1894_s5 + $0x18] ss:$0 sps:$4 sm:$0x11]   ;;  %s1907_s25 = sshll.u32 %s1769_s18, 2 }
  0x22   : > { %v475_v18 = vld [vmem:[%s473_s22] sm:$0xff]  ;;  %v745_v30 = vsel %vm548_vm0, %v1416_v25, 0  ;;  %v1417_v32 = vld [vmem:[%s1894_s5 + $0x10] sm:$0xff]   ;;  %v1418_v33 = vld [vmem:[%s1894_s5 + $0x8] sm:$0xff]   ;;  %vm804_vm7 = vcmask 80896   ;;  %vm788_vm8 = vcmask 76800  }
  0x23   : > { %v476_v19 = vpack.c.bf16 %v475_v18, %v475_v18  ;;  %v1415_v21 = vld [vmem:[%s1919_s3] sm:$0xff]   ;;  %v1409_v39 = vld [vmem:[%s1900_s11 + $0x30] ss:$0 sps:$4 sm:$0x33]   ;;  %s1781_s15 = scalar_lea.vmem [#allocation2], %s1907_s25  ;;  %v1423_v57 = vld [vmem:[%s1898_s9 + $0x8] sm:$0xff]  }
  0x24   : > { %1270 = vmatpush3.bf16.msra.mxu0 %v1401_v5  ;;  %1290 = vmatpush3.bf16.msra.mxu1 %v1410_v9  ;;  %v1181_v22 = vld [vmem:[%s1921_s2] ss:$0 sm:$0xff]  ;;  %v1000_v44 = vsel %vm659_vm2, %v1409_v39, 0  ;;  %v1421_v48 = vld [vmem:[%s1898_s9 + $0x18] ss:$0 sps:$4 sm:$0x11]  }
  0x25   : > { %1271 = vmatprep.subr.bf16.mxu0 %v1527_v1  ;;  %1291 = vmatprep.subr.bf16.mxu1 %v1527_v1  ;;  %v1419_v34 = vld [vmem:[%s1894_s5] sm:$0xff]   ;;  %v893_v53 = vsel %vm548_vm0, %v1421_v48, 0  ;;  %v1422_v56 = vld [vmem:[%s1898_s9 + $0x10] sm:$0xff]   ;;  %v1425_v59 = vld [vmem:[%s1900_s11 + $0x28] sm:$0xff]   ;;  %s1908_s25 = sshll.u32 %s1628_s17, 6  ;;  %s1070_s26 = sshll.u32 %s1781_s15, 4  ;;  %s1071_s26 = int_to_ptr.vmem [resolvable:$true] %s1070_s26 }
  0x26   : > { %v1420_v35 = vld [vmem:[%s1896_s7] sm:$0x1f]   ;;  %v1427_v61 = vld [vmem:[%s1900_s11 + $0x18] sm:$0xff]   ;;  %v1428_v62 = vld [vmem:[%s1900_s11 + $0x10] sm:$0xff]   ;;  %s1068_s27 = scalar_lea.hbm %s1902_s13, %s1908_s25  ;;  %s1052_s19 = scalar_lea.sflag [#allocation3], %s1769_s18 }
  0x27   : > { %v810_v36 = vsel %vm808_vm5, %v1420_v35, 0  ;;  %v1191_v37 = vld [vmem:[%s1893_s4] ss:$0 sm:$0xff]  ;;  %v1429_v8 = vld [vmem:[%s1900_s11 + $0x8] sm:$0xff]   ;;  %s1435_s28 = scalar_lea.vmem %s1071_s26, 64  ;;  %s1439_s0 = sshll.u32 %s1530_s20, 4  ;;  %s1440_s0 = int_to_ptr.vmem [resolvable:$false] %s1439_s0 }
  0x28   : > { %1272 = vmatpush3.bf16.msra.mxu0 %v1402_v6  ;;  %1292 = vmatpush3.bf16.msra.mxu1 %v1411_v11  ;;  %v1200_v47 = vld [vmem:[%s1895_s6] ss:$0 sm:$0xff]  ;;  %p1436_p11 = scmp.ne.s32.totalorder %s1071_s26, %s1435_s28  ;;  %s1441_s1 = scalar_lea.vmem %s1440_s0, 128 }
  0x29   : > { %1273 = vmatprep.subr.bf16.mxu0 %v1527_v1  ;;  %1293 = vmatprep.subr.bf16.mxu1 %v1527_v1  ;;  %v1424_v58 = vld [vmem:[%s1898_s9] sm:$0xff]   ;;  %p1442_p0 = scmp.lt.s32.totalorder %s1071_s26, %s1440_s0  ;;  %p1443_p1 = scmp.lt.s32.totalorder %s1441_s1, %s1435_s28 }
  0x2a   : > { %v1426_v60 = vld [vmem:[%s1900_s11 + $0x20] sm:$0xff]   ;;  %p1437_p12 = pnand %p1436_p11, %p1645_p5 }
  0x2b   : > { %v1206_v63 = vld [vmem:[%s1897_s8] ss:$0 sm:$0xff]  ;;  %p1444_p2 = por %p1443_p1, %p1442_p0 }
  0x2c   : > { %1274 = vmatpush3.bf16.msra.mxu0 %v1403_v10  ;;  %1294 = vmatpush3.bf16.msra.mxu1 %v1412_v13  ;;  %v1430_v9 = vld [vmem:[%s1900_s11] sm:$0xff]   ;;  %p1438_p13 = pneg %p1437_p12 }
  0x2d   : > { %1275 = vmatprep.subr.bf16.mxu0 %v1527_v1  ;;  %1295 = vmatprep.subr.bf16.mxu1 %v1527_v1  ;;  %v1209_v10 = vld [vmem:[%s1899_s10] ss:$0 sm:$0xff] }
  0x2e   : > { %p1445_p3 = pnand %p1444_p2, %p1438_p13 }
  0x30   : > { %1276 = vmatpush3.bf16.msra.mxu0 %v1404_v12  ;;  %1296 = vmatpush3.bf16.msra.mxu1 %v1413_v15 }
  0x31   : > { %1277 = vmatprep.subr.bf16.mxu0 %v1527_v1  ;;  %1297 = vmatprep.subr.bf16.mxu1 %v1527_v1 }
  0x34   : > { %1278 = vmatpush3.bf16.msra.mxu0 %v1405_v14  ;;  %1298 = vmatpush3.bf16.msra.mxu1 %v1414_v20 }
  0x35   : > { %1279 = vmatprep.subr.bf16.mxu0 %v1527_v1  ;;  %1299 = vmatprep.subr.bf16.mxu1 %v1527_v1 }
  0x38   : > { %1280 = vmatpush3.bf16.msra.mxu0 %v1406_v16  ;;  %1300 = vmatpush3.bf16.msra.mxu1 %v1415_v21 }
  0x39   : > { %1281 = vmatprep.subr.bf16.mxu0 %v1527_v1  ;;  %1305 = vmatprep.subr.bf16.mxu1 %v1527_v1 }
  0x3c   : > { %1282 = vmatpush3.bf16.msra.mxu0 %v1407_v17 }
  0x3d   : > { %1317 = vmatprep.subr.bf16.mxu0 %v1527_v1 }
  0x3f   : > { %1284 = vmatmul.mubr.msk.bf16.vlgmr.msra.gmra.mxu0 %vm544_vm3, %v476_v19 }
  0x40   : > { %1319 = vmatprep.mubr.msk.bf16.mxu0 %vm1529_vm1, %v1527_v1  ;;  %1318 = vmatpush3.bf16.msra.mxu0 %v810_v36 }
  0x41   : > { %1323 = vmatprep.subr.bf16.mxu0 %v1527_v1 }
  0xff   : > { %v588_v23 = vpop.f32.mrf.mxu0 }
 0x100   : > { %v589_v24 = vadd.f32 %v1181_v22, %v588_v23 }
 0x101   : > { %v1285_v26 = vpop.f32.mrf.mxu0 }
 0x102   : > { %v594_v27 = vmax.f32 %v589_v24, 0.0 }
 0x103   : > { %v591_v28 = vpop.f32.mrf.mxu0 }
 0x104   : > { %v595_v29 = vpack.c.bf16 %v594_v27, %v594_v27 }
 0x105   : > { %v1286_v31 = vpop.f32.mrf.mxu0 }
 0x106   : > { %1302 = vmatmul.mubr.msk.bf16.vlgmr.msra.gmra.mxu1 %vm655_vm4, %v595_v29 }
 0x107   : > { %1306 = vmatpush3.bf16.msra.mxu1 %v745_v30  ;;  %1313 = vmatprep.mubr.msk.bf16.mxu1 %vm1529_vm1, %v1527_v1 }
 0x108   : > { %1307 = vmatprep.subr.bf16.mxu1 %v1527_v1 }
 0x10b   : > { %1308 = vmatpush3.bf16.msra.mxu1 %v1417_v32 }
 0x10c   : > { %1309 = vmatprep.subr.bf16.mxu1 %v1527_v1 }
 0x10f   : > { %1310 = vmatpush3.bf16.msra.mxu1 %v1418_v33 }
 0x110   : > { %1311 = vmatprep.subr.bf16.mxu1 %v1527_v1 }
 0x113   : > { %1312 = vmatpush3.bf16.msra.mxu1 %v1419_v34 }
 0x114   : > { %1335 = vmatprep.subr.bf16.mxu1 %v1527_v1 }
 0x1c6   : > { %v697_v38 = vpop.f32.mrf.mxu1 }
 0x1c7   : > { %v698_v40 = vadd.f32 %v1191_v37, %v697_v38 }
 0x1c8   : > { %v1303_v41 = vpop.f32.mrf.mxu1 }
 0x1c9   : > { %v703_v42 = vmax.f32 %v698_v40, 0.0 }
 0x1ca   : > { %v700_v43 = vpop.f32.mrf.mxu1 }
 0x1cb   : > { %v704_v45 = vpack.c.bf16 %v703_v42, %v703_v42 }
 0x1cc   : > { %v1304_v46 = vpop.f32.mrf.mxu1 }
 0x1cd   : > { %1314 = vmatmul.mubr.msk.bf16.vlgmr.msra.gmra.mxu1 %vm740_vm6, %v704_v45 }
 0x1ce   : > { %1336 = vmatpush3.bf16.msra.mxu1 %v1000_v44  ;;  %1349 = vmatprep.mubr.msk.bf16.mxu1 %vm1529_vm1, %v1527_v1 }
 0x1cf   : > { %1337 = vmatprep.subr.bf16.mxu1 %v1527_v1 }
 0x1d2   : > { %1338 = vmatpush3.bf16.msra.mxu1 %v1425_v59 }
 0x1d3   : > { %1339 = vmatprep.subr.bf16.mxu1 %v1527_v1 }
 0x1d6   : > { %1340 = vmatpush3.bf16.msra.mxu1 %v1426_v60 }
 0x1d7   : > { %1341 = vmatprep.subr.bf16.mxu1 %v1527_v1 }
 0x1da   : > { %1342 = vmatpush3.bf16.msra.mxu1 %v1427_v61 }
 0x1db   : > { %1343 = vmatprep.subr.bf16.mxu1 %v1527_v1 }
 0x1de   : > { %1344 = vmatpush3.bf16.msra.mxu1 %v1428_v62 }
 0x1df   : > { %1345 = vmatprep.subr.bf16.mxu1 %v1527_v1 }
 0x1e2   : > { %1346 = vmatpush3.bf16.msra.mxu1 %v1429_v8 }
 0x1e3   : > { %1347 = vmatprep.subr.bf16.mxu1 %v1527_v1 }
 0x1e6   : > { %1348 = vmatpush3.bf16.msra.mxu1 %v1430_v9 }
 0x28d   : > { %v781_v49 = vpop.f32.mrf.mxu1 }
 0x28e   : > { %v782_v50 = vadd.f32 %v1200_v47, %v781_v49 }
 0x28f   : > { %v1315_v51 = vpop.f32.mrf.mxu1 }
 0x290   : > { %v787_v52 = vpack.c.bf16 %v782_v50, %v782_v50 }
 0x291   : > { %v784_v54 = vpop.f32.mrf.mxu1 }
 0x292   : > { %1320 = vmatmul.mubr.msk.bf16.vlgmr.msra.gmra.mxu0 %vm804_vm7, %v787_v52  ;;  %789 = vst.msk [vmem:[%s1781_s15] sm:$0xf] %vm788_vm8, %v787_v52 }
 0x293   : > { %v1316_v55 = vpop.f32.mrf.mxu1  ;;  %1324 = vmatpush3.bf16.msra.mxu0 %v893_v53  ;;  %1331 = vmatprep.mubr.msk.bf16.mxu0 %vm1529_vm1, %v1527_v1 }
 0x294   : > { %1325 = vmatprep.subr.bf16.mxu0 %v1527_v1 }
 0x297   : > { %1326 = vmatpush3.bf16.msra.mxu0 %v1422_v56 }
 0x298   : > { %1327 = vmatprep.subr.bf16.mxu0 %v1527_v1 }
 0x29b   : > { %1328 = vmatpush3.bf16.msra.mxu0 %v1423_v57 }
 0x29c   : > { %1329 = vmatprep.subr.bf16.mxu0 %v1527_v1 }
 0x29f   : > { %1330 = vmatpush3.bf16.msra.mxu0 %v1424_v58 }
 0x352   : > { %v846_v0 = vpop.f32.mrf.mxu0 }
 0x353   : > { %v847_v2 = vadd.f32 %v1206_v63, %v846_v0 }
 0x354   : > { %v1321_v3 = vpop.f32.mrf.mxu0 }
 0x355   : > { %v852_v4 = vmax.f32 %v847_v2, 0.0 }
 0x356   : > { %v849_v5 = vpop.f32.mrf.mxu0 }
 0x357   : > { %v853_v6 = vpack.c.bf16 %v852_v4, %v852_v4 }
 0x358   : > { %v1322_v7 = vpop.f32.mrf.mxu0 }
 0x359   : > { %1332 = vmatmul.mubr.msk.bf16.vlgmr.msra.gmra.mxu0 %vm740_vm6, %v853_v6 }
 0x419   : > { %v929_v11 = vpop.f32.mrf.mxu0 }
 0x41a   : > { %v930_v12 = vadd.f32 %v1209_v10, %v929_v11 }
 0x41b   : > { %v1333_v13 = vpop.f32.mrf.mxu0 }
 0x41c   : > { %v935_v14 = vmax.f32 %v930_v12, 0.0 }
 0x41d   : > { %v932_v15 = vpop.f32.mrf.mxu0 }
 0x41e   : > { %v936_v16 = vpack.c.bf16 %v935_v14, %v935_v14 }
 0x41f   : > { %v1334_v17 = vpop.f32.mrf.mxu0 }
 0x420   : > { %1350 = vmatmul.mubr.msk.bf16.vlgmr.msra.gmra.mxu1 %vm655_vm4, %v936_v16 }
 0x421   : > { %1448 = shalt.err (!%p1445_p3)
}
 0x422   : > { %s1449_s2 = scalar_lea.hbm %s1068_s27, 64  ;;  %s1453_s22 = scalar_lea.hbm %s1902_s13, 128 }
 0x423   : > { %p1450_p4 = scmp.ne.s32.totalorder %s1068_s27, %s1449_s2  ;;  %p1454_p9 = scmp.lt.s32.totalorder %s1068_s27, %s1902_s13 }
 0x424   : > { %p1455_p10 = scmp.lt.s32.totalorder %s1453_s22, %s1449_s2 }
 0x425   : > { %p1451_p7 = pnand %p1450_p4, %p1645_p5 }
 0x426   : > { %p1456_p11 = por %p1455_p10, %p1454_p9 }
 0x427   : > { %p1452_p8 = pneg %p1451_p7 }
 0x429   : > { %p1457_p12 = pnand %p1456_p11, %p1452_p8 }
 0x42b   : > { %1460 = shalt.err (!%p1457_p12)
}
 0x42c   : > { %1353 = dma.vmem_to_hbm [thread:$0]  (%p1645_p5), %s1071_s26, 64, %s1068_s27, %s1052_s19   ;;  %v1215_v1 = vld [vmem:[%s1901_s12] ss:$0 sm:$0xff]  ;;  %vm1049_vm9 = vcmask 920576  }
 0x42d   : > { %s1922_s2 = sshll.u32 %s1769_s18, 2  ;;  %s1923_s27 = sshll.u32 %s1628_s17, 6 }
 0x42e   : > { %s469_s3 = scalar_lea.vmem [#allocation4], %s1922_s2  ;;  %s1081_s28 = scalar_lea.hbm %s1903_s14, %s1923_s27 }
 0x42f   : > { %s1083_s25 = sshll.u32 %s469_s3, 4  ;;  %s1057_s20 = scalar_lea.sflag [#allocation5], %s1769_s18  ;;  %s1084_s25 = int_to_ptr.vmem [resolvable:$true] %s1083_s25 }
 0x430   : > { %s1461_s15 = scalar_lea.vmem %s1084_s25, 64  ;;  %s1531_s21 = smov [#allocation4]  }
 0x431   : > { %p1462_p13 = scmp.ne.s32.totalorder %s1084_s25, %s1461_s15  ;;  %s1465_s22 = sshll.u32 %s1531_s21, 4  ;;  %s1466_s22 = int_to_ptr.vmem [resolvable:$false] %s1465_s22 }
 0x432   : > { %s1467_s0 = scalar_lea.vmem %s1466_s22, 128  ;;  %p1468_p2 = scmp.lt.s32.totalorder %s1084_s25, %s1466_s22 }
 0x433   : > { %p1463_p0 = pnand %p1462_p13, %p1645_p5  ;;  %p1469_p3 = scmp.lt.s32.totalorder %s1467_s0, %s1461_s15 }
 0x435   : > { %p1464_p1 = pneg %p1463_p0  ;;  %p1470_p4 = por %p1469_p3, %p1468_p2 }
 0x437   : > { %p1471_p7 = pnand %p1470_p4, %p1464_p1 }
 0x4e0   : > { %v1036_v18 = vpop.f32.mrf.mxu1 }
 0x4e1   : > { %v1037_v19 = vadd.f32 %v1215_v1, %v1036_v18 }
 0x4e2   : > { %v1351_v20 = vpop.f32.mrf.mxu1 }
 0x4e3   : > { %v1042_v21 = vsub.f32 0.0, %v1037_v19 }
 0x4e4   : > { %v1039_v22 = vpop.f32.mrf.mxu1 }
 0x4e5   : > { %v1043_v23 = vmin.f32 %v1042_v21, 30.0 }
 0x4e6   : > { %v1352_v24 = vpop.f32.mrf.mxu1 }
 0x4e7   : > { %v1044_v25 = vmul.f32 1.442695, %v1043_v23 }
 0x4e9   : > { %1431 = vpow2.f32 %v1044_v25 }
 0x4f6   : > { %v1432_v26 = vpop.eup %1431 }
 0x4f7   : > { %v1046_v27 = vadd.f32 1.0, %v1432_v26 }
 0x4f9   : > { %1433 = vrcp.f32 %v1046_v27 }
 0x506   : > { %v1434_v28 = vpop.eup %1433 }
 0x507   : > { %v1048_v29 = vpack.c.bf16 %v1434_v28, %v1434_v28 }
 0x509   : > { %1050 = vst.msk [vmem:[%s469_s3] sm:$0xf] %vm1049_vm9, %v1048_v29 }
 0x50a   : > { %1474 = shalt.err (!%p1471_p7)
}
 0x50b   : > { %s1475_s17 = scalar_lea.hbm %s1081_s28, 64  ;;  %s1479_s2 = scalar_lea.hbm %s1903_s14, 128 }
 0x50c   : > { %p1476_p8 = scmp.ne.s32.totalorder %s1081_s28, %s1475_s17  ;;  %p1480_p11 = scmp.lt.s32.totalorder %s1081_s28, %s1903_s14 }
 0x50d   : > { %p1481_p12 = scmp.lt.s32.totalorder %s1479_s2, %s1475_s17 }
 0x50e   : > { %p1477_p9 = pnand %p1476_p8, %p1645_p5 }
 0x50f   : > { %p1482_p13 = por %p1481_p12, %p1480_p11 }
 0x510   : > { %p1478_p10 = pneg %p1477_p9 }
 0x512   : > { %p1483_p0 = pnand %p1482_p13, %p1478_p10 }
 0x514   : > { %1486 = shalt.err (!%p1483_p0)
}
 0x515   : > { %1354 = dma.vmem_to_hbm [thread:$0]  (%p1645_p5), %s1084_s25, 64, %s1081_s28, %s1057_s20  }
 0x516 PF: > { %p1364_p1 = scmp.ge.s32.totalorder %s1525_s16, 2  ;;  %s1095_s26 = sand.u32 1, %s1513_s29  }
 0x517   : > { %s1096_s19 = scalar_lea.sflag [#allocation3], %s1095_s26 }
 0x518   : > { %p1358_p2 = pnand %p1364_p1, %p1649_p6 }
 0x51a   : > { %p1359_p3 = pneg %p1358_p2 }
 0x51c   : > { %1504 = dma.done.wait (%p1359_p3), %s1096_s19, 64  }
 0x51d   : > { %1506 = vsyncadd (%p1359_p3), %s1096_s19, 4294967232  ;;  %s1105_s15 = scalar_lea.sflag [#allocation5], %s1095_s26 }
 0x51e   : > { %1508 = dma.done.wait (%p1359_p3), %s1105_s15, 64  }
 0x51f   : > { %1510 = vsyncadd (%p1359_p3), %s1105_s15, 4294967232  ;;  %s1924_s16 = sld [smem:[#allocation9_spill]]  ;;  %s1927_s29 = smov %s1517_s30 }
 0x520   : > { %s1925_s21 = sld [smem:[#allocation8_spill]] }
 0x521   : > { %s1926_s15 = sld [smem:[#allocation10_spill]] }
 0x525   : > { %p28_p5 = scmp.ge.s32.totalorder %s1924_s16, 4  }
 0x526   : > { %s1928_s30 = smov %s1925_s21 }
 0x527   :  { %30 = sbr.rel (!%p28_p5) target bundleno = 10 (0xa), region = 124 }
 0x52c   :  { %1110 = vsyncpa [#allocation3], 1 }
 0x52d   :  { %1112 = vsyncpa [#allocation3 + $0x1], 1 }
 0x52e   :  { %1113 = vsyncpa [#allocation5], 1 }
 0x52f   :  { %1115 = vsyncpa [#allocation5 + $0x1], 1 }

</bundles_post_ra>
